<compile_context>
chip_gen: v7x
topology: tpu7x:2x2x1
jax: 0.10.0
libtpu: 0.0.40
codegen_flags: <defaults>
</compile_context>

<pallas_src>
import functools
from typing import NamedTuple

import jax
import jax.numpy as jnp
from jax.experimental import pallas as pl
from jax.experimental.pallas import tpu as pltpu

LN_EPS = 1e-5          # torch.nn.LayerNorm default
LANE = 128
SUBLANE = 8


def _round_up(x, m):
    return ((x + m - 1) // m) * m


class MLPConfig(NamedTuple):
    e_in: int
    h: int
    e_out: int
    th: int                 # hidden-dim chunk size (multiple of 128, divides H_p)
    vmem_cap: int           # device VMEM capacity in bytes
    is_v5e: bool
    force_stream: bool = False   # debug/testing: force the streaming fallback


def _device_info():
    """Per-generation VMEM capacity + v5e detection (safe fallbacks)."""
    vmem_cap = 64 * 1024 * 1024          # conservative default (v7x per-TC VMEM)
    is_v5e = False
    try:
        vmem_cap = int(pltpu.get_tpu_info().vmem_capacity_bytes)
    except Exception:
        pass
    try:
        kind = jax.devices()[0].device_kind.lower()
        is_v5e = ("v5 lite" in kind) or ("v5e" in kind) or ("v5litepod" in kind)
    except Exception:
        pass
    return vmem_cap, is_v5e


def _choose_tm(m8, tm_max):
    """Pick a row-tile size (multiple of 8) bounding padded-row waste to ~25%."""
    cands = [c for c in (256, 128, 64, 32, 16, 8) if c <= tm_max] or [8]
    if m8 <= cands[0]:
        return m8                                   # single tile, zero padding
    for c in cands:
        mp = _round_up(m8, c)
        if (mp - m8) * 4 <= mp:                     # <= 25% padded rows
            return c
    return min(cands, key=lambda c: (_round_up(m8, c), -c))


# ---------------------------------------------------------------------------
# Kernels
# ---------------------------------------------------------------------------

def _layernorm_bf16(x_ref, gamma_ref, beta_ref, inv_e_in, n_pad_in, out_dtype):
    """Torch-style (biased) LayerNorm; exact over zero-padded feature lanes."""
    x = x_ref[...].astype(jnp.float32)
    mean = jnp.sum(x, axis=-1, keepdims=True) * inv_e_in
    xc = x - mean
    ss = jnp.sum(xc * xc, axis=-1, keepdims=True)
    if n_pad_in:                                    # padded lanes contribute mean^2 each
        ss = ss - n_pad_in * (mean * mean)
    var = ss * inv_e_in
    xn = xc * jax.lax.rsqrt(var + LN_EPS)
    xn = xn * gamma_ref[...] + beta_ref[...]        # padded gamma/beta are 0
    return xn.astype(out_dtype)


def _mlp_kernel_resident(x_ref, gamma_ref, beta_ref, w1_ref, b1_ref, w2_ref,
                         b2_ref, o_ref, *scratch, inv_e_in, n_pad_in, th, n_h):
    """1-D grid over row tiles; full W1/W2 resident in VMEM (DMA'd once).
    The H reduction is a statically unrolled loop over 128-aligned chunks."""
    acc_ref = scratch[0] if scratch else o_ref      # f32 output accumulates in-place

    xn = _layernorm_bf16(x_ref, gamma_ref, beta_ref, inv_e_in, n_pad_in,
                         w1_ref.dtype)

    for k in range(n_h):                            # static offsets -> plain slices
        off = k * th
        h = jnp.dot(xn, w1_ref[:, pl.ds(off, th)],
                    preferred_element_type=jnp.float32)
        h = jnp.maximum(h + b1_ref[:, pl.ds(off, th)], 0.0)
        contrib = jnp.dot(h.astype(w2_ref.dtype), w2_ref[pl.ds(off, th), :],
                          preferred_element_type=jnp.float32)
        if k == 0:
            acc_ref[...] = contrib                  # no separate zero-fill pass
        else:
            acc_ref[...] += contrib

    o_ref[...] = (acc_ref[...] + b2_ref[...]).astype(o_ref.dtype)


def _mlp_kernel_stream(x_ref, gamma_ref, beta_ref, w1_ref, b1_ref, w2_ref,
                       b2_ref, o_ref, xn_ref, *scratch, inv_e_in, n_pad_in):
    """Fallback 2-D grid (row_tiles, h_tiles); weights streamed per h tile.
    LayerNorm is computed once per row tile and cached in bf16."""
    acc_ref = scratch[0] if scratch else o_ref
    h_idx = pl.program_id(1)

    @pl.when(h_idx == 0)
    def _():
        xn_ref[...] = _layernorm_bf16(x_ref, gamma_ref, beta_ref, inv_e_in,
                                      n_pad_in, xn_ref.dtype)
        acc_ref[...] = jnp.zeros_like(acc_ref)

    h = jnp.dot(xn_ref[...], w1_ref[...], preferred_element_type=jnp.float32)
    h = jnp.maximum(h + b1_ref[...], 0.0)
    acc_ref[...] += jnp.dot(h.astype(w2_ref.dtype), w2_ref[...],
                            preferred_element_type=jnp.float32)

    @pl.when(h_idx == pl.num_programs(1) - 1)
    def _():
        o_ref[...] = (acc_ref[...] + b2_ref[...]).astype(o_ref.dtype)


# ---------------------------------------------------------------------------
# Parameter prep (one-time; hoisted out of the forward path)
# ---------------------------------------------------------------------------

def prepare_mlp_params(gamma, beta, w1, b1, w2, b2, *, th=None,
                       weight_dtype=jnp.bfloat16, force_stream=False):
    """Pads feature dims to lane multiples and casts weights to the MXU dtype
    ONCE. The per-call forward path only touches activations."""
    E_in, H = w1.shape
    E_out = w2.shape[1]
    vmem_cap, is_v5e = _device_info()

    if th is None:
        th = 1024 if vmem_cap >= 100 * 1024 * 1024 else 512
    th = _round_up(min(th, _round_up(H, LANE)), LANE)
    E_in_p = _round_up(E_in, LANE)
    E_out_p = _round_up(E_out, LANE)
    H_p = _round_up(H, th)

    def pad1(v, n):
        return jnp.pad(v.astype(jnp.float32), (0, n - v.shape[0])).reshape(1, n)

    return {
        "gamma": pad1(gamma, E_in_p),
        "beta": pad1(beta, E_in_p),
        "w1": jnp.pad(w1, ((0, E_in_p - E_in), (0, H_p - H))).astype(weight_dtype),
        "b1": pad1(b1, H_p),
        "w2": jnp.pad(w2, ((0, H_p - H), (0, E_out_p - E_out))).astype(weight_dtype),
        "b2": pad1(b2, E_out_p),
        "cfg": MLPConfig(e_in=E_in, h=H, e_out=E_out, th=th,
                         vmem_cap=vmem_cap, is_v5e=is_v5e,
                         force_stream=force_stream),
    }


# ---------------------------------------------------------------------------
# Forward
# ---------------------------------------------------------------------------

@functools.partial(jax.jit, static_argnames=("cfg",))
def _mlp_forward_impl(x, gamma, beta, w1, b1, w2, b2, *, cfg):
    B, T, E_in = x.shape
    assert E_in == cfg.e_in
    E_in_p, H_p = w1.shape
    E_out_p = w2.shape[1]
    E_out = cfg.e_out
    out_dtype = x.dtype
    x_bytes = x.dtype.itemsize
    out_bytes = jnp.dtype(out_dtype).itemsize
    w_bytes = w1.dtype.itemsize
    acc_needed = out_dtype != jnp.float32

    M = B * T
    M8 = _round_up(M, SUBLANE)
    small_cap = cfg.vmem_cap < 100 * 1024 * 1024
    tm_max = 128 if (small_cap or cfg.is_v5e) else 256   # v7x (64 MiB) & v5e: smaller row tile
    tm = _choose_tm(M8, tm_max)
    th = min(cfg.th, H_p)                                # cfg.th divides H_p by construction
    n_h = H_p // th

    budget = int(0.80 * cfg.vmem_cap)
    bias_bytes = (2 * E_in_p + H_p + E_out_p) * 4

    def est_resident(tm_):
        return (2 * (E_in_p * H_p + H_p * E_out_p) * w_bytes   # weights (conservative 2x)
                + 2 * tm_ * E_in_p * x_bytes                   # x tile (double-buffered)
                + 2 * tm_ * E_out_p * out_bytes                # out tile
                + tm_ * E_in_p * 2                             # xn value (bf16)
                + tm_ * th * 4                                 # per-chunk hidden
                + (tm_ * E_out_p * 4 if acc_needed else 0)
                + 2 * bias_bytes)

    def est_stream(tm_, th_):
        return (2 * tm_ * E_in_p * x_bytes
                + 2 * E_in_p * th_ * w_bytes
                + 2 * th_ * E_out_p * w_bytes
                + 2 * tm_ * E_out_p * out_bytes
                + tm_ * E_in_p * 2
                + tm_ * th_ * 4
                + (tm_ * E_out_p * 4 if acc_needed else 0)
                + 2 * bias_bytes)

    resident = ((not cfg.force_stream) and n_h <= 16
                and est_resident(tm) <= budget)

    if not resident:
        # Defensive tile shrink so streaming tiles fit the per-generation budget.
        while est_stream(tm, th) > budget:
            if th >= 256 and (th // 2) % LANE == 0 and H_p % (th // 2) == 0:
                th //= 2
            elif tm >= 16 and (tm // 2) % SUBLANE == 0:
                tm //= 2
            else:
                break

    M_p = _round_up(M8, tm)
    n_row = M_p // tm

    x2 = x.reshape(M, E_in)
    if M_p != M or E_in_p != E_in:                       # skip pad when aligned
        x2 = jnp.pad(x2, ((0, M_p - M), (0, E_in_p - E_in)))

    inv_e_in = 1.0 / E_in
    n_pad_in = E_in_p - E_in

    weight_bytes = (E_in_p * H_p + H_p * E_out_p) * w_bytes
    flops = 2 * M_p * (E_in_p * H_p + H_p * E_out_p)
    bytes_accessed = int(M_p * E_in_p * x_bytes + M_p * E_out_p * out_bytes
                         + weight_bytes * (1 if resident else n_row)
                         + bias_bytes)
    cost = pl.CostEstimate(flops=flops, transcendentals=M_p,
                           bytes_accessed=bytes_accessed)

    vmem_est = est_resident(tm) if resident else est_stream(tm, th)
    vmem_limit = int(min(int(0.95 * cfg.vmem_cap),
                         max(32 * 1024 * 1024, int(1.25 * vmem_est))))

    if resident:
        kernel = functools.partial(_mlp_kernel_resident, inv_e_in=inv_e_in,
                                   n_pad_in=n_pad_in, th=th, n_h=n_h)
        grid = (n_row,)
        in_specs = [
            pl.BlockSpec((tm, E_in_p), lambda i: (i, 0)),        # x rows
            pl.BlockSpec((1, E_in_p), lambda i: (0, 0)),         # gamma
            pl.BlockSpec((1, E_in_p), lambda i: (0, 0)),         # beta
            pl.BlockSpec((E_in_p, H_p), lambda i: (0, 0)),       # W1 (resident)
            pl.BlockSpec((1, H_p), lambda i: (0, 0)),            # b1
            pl.BlockSpec((H_p, E_out_p), lambda i: (0, 0)),      # W2 (resident)
            pl.BlockSpec((1, E_out_p), lambda i: (0, 0)),        # b2
        ]
        out_spec = pl.BlockSpec((tm, E_out_p), lambda i: (i, 0))
        scratch = ([pltpu.VMEM((tm, E_out_p), jnp.float32)] if acc_needed else [])
        dims = ("parallel",)
    else:
        kernel = functools.partial(_mlp_kernel_stream, inv_e_in=inv_e_in,
                                   n_pad_in=n_pad_in)
        grid = (n_row, H_p // th)
        in_specs = [
            pl.BlockSpec((tm, E_in_p), lambda i, h: (i, 0)),     # x rows
            pl.BlockSpec((1, E_in_p), lambda i, h: (0, 0)),      # gamma
            pl.BlockSpec((1, E_in_p), lambda i, h: (0, 0)),      # beta
            pl.BlockSpec((E_in_p, th), lambda i, h: (0, h)),     # W1 cols
            pl.BlockSpec((1, th), lambda i, h: (0, h)),          # b1 tile
            pl.BlockSpec((th, E_out_p), lambda i, h: (h, 0)),    # W2 rows
            pl.BlockSpec((1, E_out_p), lambda i, h: (0, 0)),     # b2
        ]
        out_spec = pl.BlockSpec((tm, E_out_p), lambda i, h: (i, 0))
        scratch = [pltpu.VMEM((tm, E_in_p), jnp.bfloat16)]       # cached normalized x
        if acc_needed:
            scratch.append(pltpu.VMEM((tm, E_out_p), jnp.float32))
        dims = ("parallel", "arbitrary")

    out2 = pl.pallas_call(
        kernel,
        out_shape=jax.ShapeDtypeStruct((M_p, E_out_p), out_dtype),
        grid_spec=pltpu.PrefetchScalarGridSpec(
            num_scalar_prefetch=0,
            grid=grid,
            in_specs=in_specs,
            out_specs=out_spec,
            scratch_shapes=scratch,
        ),
        compiler_params=pltpu.CompilerParams(
            dimension_semantics=dims,
            vmem_limit_bytes=vmem_limit,
        ),
        cost_estimate=cost,
    )(x2, gamma, beta, w1, b1, w2, b2)

    if M_p != M or E_out_p != E_out:                     # skip slice when aligned
        out2 = out2[:M, :E_out]
    return out2.reshape(B, T, E_out)


def mlp_forward(x, params):
    """x: [B, T, E_in] -> [B, T, E_out] using params from prepare_mlp_params."""
    return _mlp_forward_impl(x, params["gamma"], params["beta"], params["w1"],
                             params["b1"], params["w2"], params["b2"],
                             cfg=params["cfg"])


# ---------------------------------------------------------------------------
# Init + reference + self-test
# ---------------------------------------------------------------------------

def init_params(key, input_dim, hidden_dim, output_dim):
    """Mirror torch defaults: Linear uniform(+-1/sqrt(fan_in)); LN gamma=1, beta=0."""
    k1, k2, k3, k4 = jax.random.split(key, 4)
    bound1 = 1.0 / jnp.sqrt(input_dim)
    bound2 = 1.0 / jnp.sqrt(hidden_dim)
    w1 = jax.random.uniform(k1, (input_dim, hidden_dim), jnp.float32, -bound1, bound1)
    b1 = jax.random.uniform(k2, (hidden_dim,), jnp.float32, -bound1, bound1)
    w2 = jax.random.uniform(k3, (hidden_dim, output_dim), jnp.float32, -bound2, bound2)
    b2 = jax.random.uniform(k4, (output_dim,), jnp.float32, -bound2, bound2)
    gamma = jnp.ones((input_dim,), jnp.float32)
    beta = jnp.zeros((input_dim,), jnp.float32)
    return gamma, beta, w1, b1, w2, b2


def reference_forward(x, gamma, beta, w1, b1, w2, b2):
    """Pure-JAX reference with the same bf16-MXU / f32-accumulate recipe."""
    xf = x.astype(jnp.float32)
    mean = jnp.mean(xf, axis=-1, keepdims=True)
    xc = xf - mean
    var = jnp.mean(xc * xc, axis=-1, keepdims=True)
    xn = xc * jax.lax.rsqrt(var + LN_EPS) * gamma + beta
    h = jnp.dot(xn.astype(jnp.bfloat16), w1.astype(jnp.bfloat16),
                preferred_element_type=jnp.float32)
    h = jnp.maximum(h + b1, 0.0)
    out = jnp.dot(h.astype(jnp.bfloat16), w2.astype(jnp.bfloat16),
                  preferred_element_type=jnp.float32)
    return (out + b2).astype(x.dtype)


if __name__ == "__main__":
    key = jax.random.PRNGKey(0)

    # Config 1: small [B, T, E'] shape; resident-weight path, n_h = 1.
    B, T = 2, 8
    input_dim, hidden_dim, output_dim = 32, 64, 32
    kx, kp, key = jax.random.split(key, 3)
    x = jax.random.normal(kx, (B, T, input_dim), jnp.float32)
    p1 = init_params(kp, input_dim, hidden_dim, output_dim)
    params1 = prepare_mlp_params(*p1)
    out1 = jax.block_until_ready(mlp_forward(x, params1))
    ref1 = reference_forward(x, *p1)
    assert out1.shape == (B, T, output_dim)
    err1 = float(jnp.max(jnp.abs(out1 - ref1)))
    assert jnp.allclose(out1, ref1, atol=1e-2, rtol=1e-2), f"config1 mismatch {err1}"

    # Config 2: ragged M, padded feature dims, multi-chunk hidden loop (n_h = 2).
    B2, T2 = 3, 5
    in2, hid2, out_dim2 = 48, 256, 40
    kx2, kp2, key = jax.random.split(key, 3)
    x2 = jax.random.normal(kx2, (B2, T2, in2), jnp.float32)
    p2 = init_params(kp2, in2, hid2, out_dim2)
    params2 = prepare_mlp_params(*p2, th=128)
    out2 = jax.block_until_ready(mlp_forward(x2, params2))
    ref2 = reference_forward(x2, *p2)
    assert out2.shape == (B2, T2, out_dim2)
    err2 = float(jnp.max(jnp.abs(out2 - ref2)))
    assert jnp.allclose(out2, ref2, atol=1e-2, rtol=1e-2), f"config2 mismatch {err2}"

    # Config 3: same shapes, but exercise the streaming-fallback kernel path.
    params3 = prepare_mlp_params(*p2, th=128, force_stream=True)
    out3 = jax.block_until_ready(mlp_forward(x2, params3))
    err3 = float(jnp.max(jnp.abs(out3 - ref2)))
    assert jnp.allclose(out3, ref2, atol=1e-2, rtol=1e-2), f"config3 mismatch {err3}"

    print("KERNEL_OK")
</pallas_src>

<mosaic_0001>
module attributes {stable_mosaic.version = 11 : i64} {
  func.func @_mlp_kernel_resident(%arg0: i32, %arg1: memref<16x128xf32, #tpu.memory_space<vmem>>, %arg2: memref<1x128xf32, #tpu.memory_space<vmem>>, %arg3: memref<1x128xf32, #tpu.memory_space<vmem>>, %arg4: memref<128x128xbf16, #tpu.memory_space<vmem>>, %arg5: memref<1x128xf32, #tpu.memory_space<vmem>>, %arg6: memref<128x128xbf16, #tpu.memory_space<vmem>>, %arg7: memref<1x128xf32, #tpu.memory_space<vmem>>, %arg8: memref<16x128xf32, #tpu.memory_space<vmem>>) attributes {dimension_semantics = [#tpu.dimension_semantics<parallel>], iteration_bounds = array<i64: 1>, scalar_prefetch = 0 : i64, scratch_operands = 0 : i64, tpu.core_type = #tpu.core_type<tc>, window_params = [{transform_indices = @transform_0, window_bounds = array<i64: 16, 128>}, {pipeline_mode = #tpu.pipeline_mode<synchronous>, transform_indices = @transform_1, window_bounds = array<i64: 1, 128>}, {pipeline_mode = #tpu.pipeline_mode<synchronous>, transform_indices = @transform_2, window_bounds = array<i64: 1, 128>}, {pipeline_mode = #tpu.pipeline_mode<synchronous>, transform_indices = @transform_3, window_bounds = array<i64: 128, 128>}, {pipeline_mode = #tpu.pipeline_mode<synchronous>, transform_indices = @transform_4, window_bounds = array<i64: 1, 128>}, {pipeline_mode = #tpu.pipeline_mode<synchronous>, transform_indices = @transform_5, window_bounds = array<i64: 128, 128>}, {pipeline_mode = #tpu.pipeline_mode<synchronous>, transform_indices = @transform_6, window_bounds = array<i64: 1, 128>}, {transform_indices = @transform_7, window_bounds = array<i64: 16, 128>}]} {
    %c0 = arith.constant 0 : index
    %c0_0 = arith.constant 0 : index
    %0 = vector.load %arg1[%c0, %c0_0] : memref<16x128xf32, #tpu.memory_space<vmem>>, vector<16x128xf32>
    %cst = arith.constant dense<0.000000e+00> : vector<16xf32>
    %1 = vector.multi_reduction <add>, %0, %cst [1] : vector<16x128xf32> to vector<16xf32>
    %2 = vector.shape_cast %1 : vector<16xf32> to vector<16x1xf32>
    %cst_1 = arith.constant 3.125000e-02 : f32
    %3 = vector.broadcast %cst_1 : f32 to vector<16x1xf32>
    %4 = arith.mulf %2, %3 : vector<16x1xf32>
    %5 = vector.broadcast %4 : vector<16x1xf32> to vector<16x128xf32>
    %6 = arith.subf %0, %5 : vector<16x128xf32>
    %7 = arith.mulf %6, %6 : vector<16x128xf32>
    %cst_2 = arith.constant dense<0.000000e+00> : vector<16xf32>
    %8 = vector.multi_reduction <add>, %7, %cst_2 [1] : vector<16x128xf32> to vector<16xf32>
    %9 = vector.shape_cast %8 : vector<16xf32> to vector<16x1xf32>
    %10 = arith.mulf %4, %4 : vector<16x1xf32>
    %cst_3 = arith.constant 9.600000e+01 : f32
    %11 = vector.broadcast %cst_3 : f32 to vector<16x1xf32>
    %12 = arith.mulf %11, %10 : vector<16x1xf32>
    %13 = arith.subf %9, %12 : vector<16x1xf32>
    %cst_4 = arith.constant 3.125000e-02 : f32
    %14 = vector.broadcast %cst_4 : f32 to vector<16x1xf32>
    %15 = arith.mulf %13, %14 : vector<16x1xf32>
    %cst_5 = arith.constant 9.99999974E-6 : f32
    %16 = vector.broadcast %cst_5 : f32 to vector<16x1xf32>
    %17 = arith.addf %15, %16 : vector<16x1xf32>
    %18 = math.rsqrt %17 : vector<16x1xf32>
    %19 = vector.broadcast %18 : vector<16x1xf32> to vector<16x128xf32>
    %20 = arith.mulf %6, %19 : vector<16x128xf32>
    %c0_6 = arith.constant 0 : index
    %c0_7 = arith.constant 0 : index
    %21 = vector.load %arg2[%c0_6, %c0_7] : memref<1x128xf32, #tpu.memory_space<vmem>>, vector<1x128xf32>
    %22 = vector.broadcast %21 : vector<1x128xf32> to vector<16x128xf32>
    %23 = arith.mulf %20, %22 : vector<16x128xf32>
    %c0_8 = arith.constant 0 : index
    %c0_9 = arith.constant 0 : index
    %24 = vector.load %arg3[%c0_8, %c0_9] : memref<1x128xf32, #tpu.memory_space<vmem>>, vector<1x128xf32>
    %25 = vector.broadcast %24 : vector<1x128xf32> to vector<16x128xf32>
    %26 = arith.addf %23, %25 : vector<16x128xf32>
    %27 = arith.truncf %26 : vector<16x128xf32> to vector<16x128xbf16>
    %c0_10 = arith.constant 0 : index
    %c0_11 = arith.constant 0 : index
    %28 = vector.load %arg4[%c0_10, %c0_11] : memref<128x128xbf16, #tpu.memory_space<vmem>>, vector<128x128xbf16>
    %cst_12 = arith.constant dense<0.000000e+00> : vector<16x128xf32>
    %29 = tpu.matmul %27, %28, %cst_12 {dimension_numbers = #tpu.dot_dimension_numbers<[1], [0], [0], [1], [0, 0, 1, 1], [], []>} : vector<16x128xbf16>, vector<128x128xbf16>, vector<16x128xf32> -> vector<16x128xf32>
    %c0_13 = arith.constant 0 : index
    %c0_14 = arith.constant 0 : index
    %30 = vector.load %arg5[%c0_13, %c0_14] : memref<1x128xf32, #tpu.memory_space<vmem>>, vector<1x128xf32>
    %31 = vector.broadcast %30 : vector<1x128xf32> to vector<16x128xf32>
    %32 = arith.addf %29, %31 : vector<16x128xf32>
    %cst_15 = arith.constant 0.000000e+00 : f32
    %33 = vector.broadcast %cst_15 : f32 to vector<16x128xf32>
    %34 = arith.maximumf %32, %33 : vector<16x128xf32>
    %35 = arith.truncf %34 : vector<16x128xf32> to vector<16x128xbf16>
    %c0_16 = arith.constant 0 : index
    %c0_17 = arith.constant 0 : index
    %36 = vector.load %arg6[%c0_16, %c0_17] : memref<128x128xbf16, #tpu.memory_space<vmem>>, vector<128x128xbf16>
    %cst_18 = arith.constant dense<0.000000e+00> : vector<16x128xf32>
    %37 = tpu.matmul %35, %36, %cst_18 {dimension_numbers = #tpu.dot_dimension_numbers<[1], [0], [0], [1], [0, 0, 1, 1], [], []>} : vector<16x128xbf16>, vector<128x128xbf16>, vector<16x128xf32> -> vector<16x128xf32>
    %c0_19 = arith.constant 0 : index
    %c0_20 = arith.constant 0 : index
    %38 = vector.load %arg8[%c0_19, %c0_20] : memref<16x128xf32, #tpu.memory_space<vmem>>, vector<16x128xf32>
    tpu.vector_store %arg8[%c0_19, %c0_20], %37 {strides = array<i32>} : memref<16x128xf32, #tpu.memory_space<vmem>>, vector<16x128xf32>,
    %c0_21 = arith.constant 0 : index
    %c0_22 = arith.constant 0 : index
    %39 = vector.load %arg8[%c0_21, %c0_22] : memref<16x128xf32, #tpu.memory_space<vmem>>, vector<16x128xf32>
    %c0_23 = arith.constant 0 : index
    %c0_24 = arith.constant 0 : index
    %40 = vector.load %arg7[%c0_23, %c0_24] : memref<1x128xf32, #tpu.memory_space<vmem>>, vector<1x128xf32>
    %41 = vector.broadcast %40 : vector<1x128xf32> to vector<16x128xf32>
    %42 = arith.addf %39, %41 : vector<16x128xf32>
    %c0_25 = arith.constant 0 : index
    %c0_26 = arith.constant 0 : index
    %43 = vector.load %arg8[%c0_25, %c0_26] : memref<16x128xf32, #tpu.memory_space<vmem>>, vector<16x128xf32>
    tpu.vector_store %arg8[%c0_25, %c0_26], %42 {strides = array<i32>} : memref<16x128xf32, #tpu.memory_space<vmem>>, vector<16x128xf32>,
    return
  }
  func.func @transform_0(%arg0: i32) -> (i32, i32) {
    %c0_i32 = arith.constant 0 : i32
    %c0_i32_0 = arith.constant 0 : i32
    return %arg0, %c0_i32 : i32, i32
  }
  func.func @transform_1(%arg0: i32) -> (i32, i32) {
    %c0_i32 = arith.constant 0 : i32
    %c0_i32_0 = arith.constant 0 : i32
    %c0_i32_1 = arith.constant 0 : i32
    return %c0_i32, %c0_i32_0 : i32, i32
  }
  func.func @transform_2(%arg0: i32) -> (i32, i32) {
    %c0_i32 = arith.constant 0 : i32
    %c0_i32_0 = arith.constant 0 : i32
    %c0_i32_1 = arith.constant 0 : i32
    return %c0_i32, %c0_i32_0 : i32, i32
  }
  func.func @transform_3(%arg0: i32) -> (i32, i32) {
    %c0_i32 = arith.constant 0 : i32
    %c0_i32_0 = arith.constant 0 : i32
    %c0_i32_1 = arith.constant 0 : i32
    return %c0_i32, %c0_i32_0 : i32, i32
  }
  func.func @transform_4(%arg0: i32) -> (i32, i32) {
    %c0_i32 = arith.constant 0 : i32
    %c0_i32_0 = arith.constant 0 : i32
    %c0_i32_1 = arith.constant 0 : i32
    return %c0_i32, %c0_i32_0 : i32, i32
  }
  func.func @transform_5(%arg0: i32) -> (i32, i32) {
    %c0_i32 = arith.constant 0 : i32
    %c0_i32_0 = arith.constant 0 : i32
    %c0_i32_1 = arith.constant 0 : i32
    return %c0_i32, %c0_i32_0 : i32, i32
  }
  func.func @transform_6(%arg0: i32) -> (i32, i32) {
    %c0_i32 = arith.constant 0 : i32
    %c0_i32_0 = arith.constant 0 : i32
    %c0_i32_1 = arith.constant 0 : i32
    return %c0_i32, %c0_i32_0 : i32, i32
  }
  func.func @transform_7(%arg0: i32) -> (i32, i32) {
    %c0_i32 = arith.constant 0 : i32
    %c0_i32_0 = arith.constant 0 : i32
    return %arg0, %c0_i32 : i32, i32
  }
}

</mosaic_0001>

<bundles_post_ra>
// kernel: _mlp_forward_impl.1
= control target key start
LH: loop header
LB: loop body
LE: loop exit
PB: predicated region body
PF: predicated region fallthrough
CT: control target
= control target key end

     0   :  { %12 = vsyncpa [#allocation3], 0  ;;  %s619_s0 = inlined_call_operand.vmem [shape: f32[16,128], index: 0, kind: input, shape index: {}]   ;;  %s620_s1 = inlined_call_operand.vmem [shape: f32[1,128], index: 1, kind: input, shape index: {}]   ;;  %s621_s2 = inlined_call_operand.vmem [shape: f32[1,128], index: 2, kind: input, shape index: {}]   ;;  %s622_s3 = inlined_call_operand.hbm [shape: bf16[128,128], index: 3, kind: input, shape index: {}]   ;;  %s623_s4 = inlined_call_operand.vmem [shape: f32[1,128], index: 4, kind: input, shape index: {}]   ;;  %s624_s5 = inlined_call_operand.hbm [shape: bf16[128,128], index: 5, kind: input, shape index: {}]   ;;  %s625_s6 = inlined_call_operand.vmem [shape: f32[1,128], index: 6, kind: input, shape index: {}]   ;;  %s626_s7 = inlined_call_operand.vmem [shape: f32[16,128], index: 7, kind: output, shape index: {}]  }
   0x1   :  { %13 = vsyncpa [#allocation5], 0  ;;  %s497_s24 = smov [#allocation2]   ;;  %s449_s28 = scalar_lea.hbm %s622_s3, 1024 }
   0x2   :  { %s25_s25 = sshll.u32 %s497_s24, 4  ;;  %p450_p0 = scmp.ne.s32.totalorder %s622_s3, %s449_s28  ;;  %s26_s25 = int_to_ptr.vmem [resolvable:$true] %s25_s25 }
   0x3   :  { %p453_p1 = scmp.lt.u32.totalorder %s449_s28, %s622_s3 }
   0x5   :  { %p455_p2 = pnand %p453_p1, %p450_p0 }
   0x7   :  { %458 = shalt.err (!%p455_p2)
}
   0x8   :  { %s459_s10 = scalar_lea.vmem %s26_s25, 1024  ;;  %p464_p4 = scmp.lt.s32.totalorder %s26_s25, %s26_s25 }
   0x9   :  { %p460_p3 = scmp.ne.s32.totalorder %s26_s25, %s459_s10  ;;  %p465_p5 = scmp.lt.s32.totalorder %s459_s10, %s459_s10 }
   0xb   :  { %p466_p6 = por %p465_p5, %p464_p4 }
   0xd   :  { %p467_p7 = pnand %p466_p6, %p460_p3 }
   0xf   :  { %470 = shalt.err (!%p467_p7)
}
  0x10   :  { %s498_s11 = smov 64   ;;  %s499_s12 = smov 4  }
  0x11   :  { %31 = dma.hbm_to_vmem [thread:$0]  %s622_s3, 1024, %s26_s25, [#allocation3], %s498_s11, %s498_s11, %s499_s12  }
  0x12   :  { %s500_s15 = smov [#allocation4]   ;;  %s471_s19 = scalar_lea.hbm %s624_s5, 1024 }
  0x13   :  { %s39_s16 = sshll.u32 %s500_s15, 4  ;;  %p472_p8 = scmp.ne.s32.totalorder %s624_s5, %s471_s19  ;;  %s40_s16 = int_to_ptr.vmem [resolvable:$true] %s39_s16 }
  0x14   :  { %p475_p9 = scmp.lt.u32.totalorder %s471_s19, %s624_s5 }
  0x16   :  { %p477_p10 = pnand %p475_p9, %p472_p8 }
  0x18   :  { %480 = shalt.err (!%p477_p10)
}
  0x19   :  { %s481_s24 = scalar_lea.vmem %s40_s16, 1024  ;;  %p486_p12 = scmp.lt.s32.totalorder %s40_s16, %s40_s16 }
  0x1a   :  { %p482_p11 = scmp.ne.s32.totalorder %s40_s16, %s481_s24  ;;  %p487_p13 = scmp.lt.s32.totalorder %s481_s24, %s481_s24 }
  0x1c   :  { %p488_p0 = por %p487_p13, %p486_p12 }
  0x1e   :  { %p489_p1 = pnand %p488_p0, %p482_p11 }
  0x20   :  { %492 = shalt.err (!%p489_p1)
}
  0x21   :  { %45 = dma.hbm_to_vmem [thread:$0]  %s624_s5, 1024, %s40_s16, [#allocation5], %s498_s11, %s498_s11, %s499_s12  }
  0x22   :  { %493 = dma.done.wait [#allocation3], 1024  }
  0x23   :  { %494 = vsyncadd [#allocation3], 4294966272 }
  0x24   :  { %495 = dma.done.wait [#allocation5], 1024  }
  0x25   :  { %496 = vsyncadd [#allocation5], 4294966272  ;;  %v55_v0 = vld [vmem:[%s619_s0] sm:$0xff]  ;;  %v56_v1 = vld [vmem:[%s619_s0 + $0x8] sm:$0xff]  ;;  %v501_v3 = vmov 0.0   ;;  %vm502_vm0 = vmmov 0  }
  0x26   :  { %57 = vadd.xlane.f32.xlu0 %v55_v0  ;;  %v429_v2 = vld [vmem:[#allocation2] sm:$0xff]   ;;  %383 = vmatprep.subr.bf16.mxu0 %v501_v3  ;;  %v430_v12 = vld [vmem:[#allocation2 + $0x8] sm:$0xff]   ;;  %v431_v13 = vld [vmem:[#allocation2 + $0x10] sm:$0xff]  }
  0x27   :  { %403 = vmatprep.subr.bf16.mxu1 %v501_v3  ;;  %384 = vmatpush3.bf16.msra.mxu0 %v429_v2  ;;  %v432_v14 = vld [vmem:[#allocation2 + $0x18] sm:$0xff]   ;;  %v433_v15 = vld [vmem:[#allocation2 + $0x20] sm:$0xff]   ;;  %v434_v16 = vld [vmem:[#allocation2 + $0x28] sm:$0xff]  }
  0x28   :  { %385 = vmatprep.subr.bf16.mxu0 %v501_v3  ;;  %399 = vmatprep.mubr.msk.bf16.mxu0 %vm502_vm0, %v501_v3  ;;  %v435_v17 = vld [vmem:[#allocation2 + $0x30] sm:$0xff]   ;;  %v436_v18 = vld [vmem:[#allocation2 + $0x38] sm:$0xff]   ;;  %v437_v19 = vld [vmem:[#allocation4] sm:$0xff]  }
  0x29   :  { %419 = vmatprep.mubr.msk.bf16.mxu1 %vm502_vm0, %v501_v3  ;;  %404 = vmatpush3.bf16.msra.mxu1 %v437_v19  ;;  %v438_v20 = vld [vmem:[#allocation4 + $0x8] sm:$0xff]   ;;  %v439_v21 = vld [vmem:[#allocation4 + $0x10] sm:$0xff]   ;;  %v440_v22 = vld [vmem:[#allocation4 + $0x18] sm:$0xff]  }
  0x2a   :  { %59 = vadd.xlane.f32.xlu0 %v56_v1  ;;  %405 = vmatprep.subr.bf16.mxu1 %v501_v3  ;;  %v441_v23 = vld [vmem:[#allocation4 + $0x20] sm:$0xff]   ;;  %v442_v24 = vld [vmem:[#allocation4 + $0x28] sm:$0xff]   ;;  %v443_v48 = vld [vmem:[#allocation4 + $0x30] sm:$0xff]  }
  0x2b   :  { %386 = vmatpush3.bf16.msra.mxu0 %v430_v12  ;;  %v345_v39 = vld [vmem:[%s620_s1] ss:$0 sm:$0xff]  ;;  %v444_v49 = vld [vmem:[#allocation4 + $0x38] sm:$0xff]  }
  0x2c   :  { %387 = vmatprep.subr.bf16.mxu0 %v501_v3  ;;  %v346_v43 = vld [vmem:[%s621_s2] ss:$0 sm:$0xff] }
  0x2d   :  { %406 = vmatpush3.bf16.msra.mxu1 %v438_v20  ;;  %v347_v50 = vld [vmem:[%s623_s4] ss:$0 sm:$0xff] }
  0x2e   :  { %407 = vmatprep.subr.bf16.mxu1 %v501_v3  ;;  %v364_v60 = vld [vmem:[%s625_s6] ss:$0 sm:$0xff] }
  0x2f   :  { %388 = vmatpush3.bf16.msra.mxu0 %v431_v13 }
  0x30   :  { %389 = vmatprep.subr.bf16.mxu0 %v501_v3 }
  0x31   :  { %408 = vmatpush3.bf16.msra.mxu1 %v439_v21 }
  0x32   :  { %409 = vmatprep.subr.bf16.mxu1 %v501_v3 }
  0x33   :  { %390 = vmatpush3.bf16.msra.mxu0 %v432_v14 }
  0x34   :  { %391 = vmatprep.subr.bf16.mxu0 %v501_v3 }
  0x35   :  { %410 = vmatpush3.bf16.msra.mxu1 %v440_v22 }
  0x36   :  { %411 = vmatprep.subr.bf16.mxu1 %v501_v3 }
  0x37   :  { %392 = vmatpush3.bf16.msra.mxu0 %v433_v15 }
  0x38   :  { %393 = vmatprep.subr.bf16.mxu0 %v501_v3 }
  0x39   :  { %412 = vmatpush3.bf16.msra.mxu1 %v441_v23 }
  0x3a   :  { %413 = vmatprep.subr.bf16.mxu1 %v501_v3 }
  0x3b   :  { %394 = vmatpush3.bf16.msra.mxu0 %v434_v16 }
  0x3c   :  { %395 = vmatprep.subr.bf16.mxu0 %v501_v3 }
  0x3d   :  { %414 = vmatpush3.bf16.msra.mxu1 %v442_v24 }
  0x3e   :  { %415 = vmatprep.subr.bf16.mxu1 %v501_v3 }
  0x3f   :  { %396 = vmatpush3.bf16.msra.mxu0 %v435_v17 }
  0x40   :  { %397 = vmatprep.subr.bf16.mxu0 %v501_v3 }
  0x41   :  { %416 = vmatpush3.bf16.msra.mxu1 %v443_v48 }
  0x42   :  { %417 = vmatprep.subr.bf16.mxu1 %v501_v3 }
  0x43   :  { %398 = vmatpush3.bf16.msra.mxu0 %v436_v18 }
  0x45   :  { %418 = vmatpush3.bf16.msra.mxu1 %v444_v49 }
  0xb3   :  { %v58_v4 = vpop.xlane.xlu0 %57 }
  0xb4   :  { %v61_v5 = vmul.f32 0.03125, %v58_v4 }
  0xb6   :  { %v576_v6 = vsub.f32 %v55_v0, %v61_v5  ;;  %v71_v25 = vmul.f32 %v61_v5, %v61_v5 }
  0xb7   :  { %v60_v7 = vpop.xlane.xlu0 %59 }
  0xb8   :  { %v62_v8 = vmul.f32 0.03125, %v60_v7  ;;  %v65_v9 = vmul.f32 %v576_v6, %v576_v6  ;;  %v73_v27 = vmul.f32 96.0, %v71_v25 }
  0xba   :  { %v580_v10 = vsub.f32 %v56_v1, %v62_v8  ;;  %67 = vadd.xlane.f32.xlu1 %v65_v9  ;;  %v72_v26 = vmul.f32 %v62_v8, %v62_v8 }
  0xbc   :  { %v66_v11 = vmul.f32 %v580_v10, %v580_v10  ;;  %v74_v30 = vmul.f32 96.0, %v72_v26 }
  0xbe   :  { %69 = vadd.xlane.f32.xlu1 %v66_v11 }
 0x147   :  { %v68_v28 = vpop.xlane.xlu1 %67 }
 0x148   :  { %v75_v29 = vsub.f32 %v68_v28, %v73_v27 }
 0x14a   :  { %v77_v31 = vmul.f32 0.03125, %v75_v29 }
 0x14b   :  { %v70_v32 = vpop.xlane.xlu1 %69 }
 0x14c   :  { %v79_v33 = vadd.f32 1e-05, %v77_v31  ;;  %v76_v34 = vsub.f32 %v70_v32, %v74_v30 }
 0x14e   :  { %445 = vrsqrt.f32 %v79_v33  ;;  %v78_v35 = vmul.f32 0.03125, %v76_v34 }
 0x150   :  { %v80_v36 = vadd.f32 1e-05, %v78_v35 }
 0x152   :  { %447 = vrsqrt.f32 %v80_v36 }
 0x158   :  { %v446_v37 = vpop.eup %445 }
 0x159   :  { %v83_v38 = vmul.f32 %v446_v37, %v576_v6 }
 0x15b   :  { %v92_v42 = vmul.f32 %v345_v39, %v83_v38 }
 0x15c   :  { %v448_v40 = vpop.eup %447 }
 0x15d   :  { %v84_v41 = vmul.f32 %v448_v40, %v580_v10  ;;  %v101_v45 = vadd.f32 %v346_v43, %v92_v42 }
 0x15f   :  { %v93_v44 = vmul.f32 %v345_v39, %v84_v41 }
 0x161   :  { %v102_v46 = vadd.f32 %v346_v43, %v93_v44 }
 0x163   :  { %v103_v47 = vpack.c.bf16 %v102_v46, %v101_v45 }
 0x165   :  { %400 = vmatmul.mubr.bf16.vlgmr.msra.gmra.mrb[0].mxu0 %v103_v47 }
 0x238   :  { %v209_v51 = vpop.f32.mrb[0].mxu0 }
 0x239   :  { %v210_v52 = vadd.f32 %v347_v50, %v209_v51  ;;  %v401_v53 = vpop.f32.mrb[1].mxu0 }
 0x23a   :  { %v212_v54 = vpop.f32.mrb[2].mxu0 }
 0x23b   :  { %v213_v55 = vadd.f32 %v347_v50, %v212_v54  ;;  %v402_v56 = vpop.f32.mrb[3].mxu0  ;;  %v216_v57 = vmax.f32 %v210_v52, 0.0 }
 0x23d   :  { %v217_v58 = vmax.f32 %v213_v55, 0.0 }
 0x23f   :  { %v218_v59 = vpack.c.bf16 %v217_v58, %v216_v57 }
 0x241   :  { %420 = vmatmul.mubr.bf16.vlgmr.msra.gmra.mrb[0].mxu1 %v218_v59 }
 0x314   :  { %v317_v61 = vpop.f32.mrb[0].mxu1 }
 0x315   :  { %v335_v62 = vadd.f32 %v364_v60, %v317_v61  ;;  %v421_v63 = vpop.f32.mrb[1].mxu1 }
 0x316   :  { %v320_v0 = vpop.f32.mrb[2].mxu1 }
 0x317   :  { %337 = vst [vmem:[%s626_s7] sm:$0xff] %v335_v62  ;;  %v336_v1 = vadd.f32 %v364_v60, %v320_v0  ;;  %v422_v2 = vpop.f32.mrb[3].mxu1 }
 0x319   :  { %338 = vst [vmem:[%s626_s7 + $0x8] sm:$0xff] %v336_v1 }
 0x31a   :  { %343 = vsyncpa [#allocation3], 1 }
 0x31b   :  { %344 = vsyncpa [#allocation5], 1 }

</bundles_post_ra>
